<compile_context>
chip_gen: v6e
topology: v6e:2x2x1
jax: 0.10.0
libtpu: 0.0.40
codegen_flags: <defaults>
</compile_context>

<pallas_src>
import numpy as np
import jax
import jax.numpy as jnp
from jax.experimental import pallas as pl
from jax.experimental.pallas import tpu as pltpu

# ---------------- config constants ----------------
BATCH = 2
STATE_DIM = 6
IMG_H = 8
IMG_W = 8
IMG_C = 3
NUM_FILTERS = [4, 4]
FILTER_SIZE = 3
N_LAYERS = 2
DIM_HIDDEN = 32
OUT_DIM = 4

OBS_DIM = STATE_DIM + IMG_H * IMG_W * IMG_C            # 6 + 192 = 198
CONV1_H = IMG_W - (FILTER_SIZE - 1)                    # 6 (first spatial dim = "W")
CONV1_W = IMG_H - (FILTER_SIZE - 1)                    # 6
CONV2_H = CONV1_H - (FILTER_SIZE - 1)                  # 4
CONV2_W = CONV1_W - (FILTER_SIZE - 1)                  # 4
FP_ROWS = CONV2_H                                      # 4
FP_COLS = CONV2_W                                      # 4
NUM_FP = NUM_FILTERS[-1]                               # 4
FC_INPUT_DIM = 2 * NUM_FP + STATE_DIM                  # 14

CONV1_DIM = NUM_FILTERS[0] * CONV1_H * CONV1_W         # 144
CONV2_DIM = NUM_FILTERS[1] * CONV2_H * CONV2_W         # 64


# ---------------- fused Pallas kernel ----------------
def _torchnet_fused_kernel(
    x_ref,                       # VMEM [B, 198]   raw nn_input (state | image-flat)
    w1d_ref, b1d_ref,            # VMEM [198, 144], [1, 144]   conv1 lowered to dense
    w2d_ref, b2d_ref,            # VMEM [144, 64],  [1, 64]    conv2 lowered to dense
    fpnum_ref, fpden_ref,        # VMEM [64, 8], [64, 8]       spatial-softmax sums
    fw1fp_ref, fw1s_ref, fb1_ref,  # VMEM [8, 32], [6, 32], [1, 32]
    fw2_ref, fb2_ref,            # VMEM [32, 32], [1, 32]
    fw3_ref, fb3_ref,            # VMEM [32, 4],  [1, 4]
    out_ref,                     # VMEM [B, 4]
):
    x = x_ref[...]                                   # [B, 198]
    state = x[:, :STATE_DIM]                         # [B, 6] (aligned lane slice)

    # ---- conv1: one MXU matmul (state columns of w1d are zero), ReLU ----
    h1 = jnp.dot(x, w1d_ref[...], preferred_element_type=jnp.float32) + b1d_ref[...]
    h1 = jnp.maximum(h1, 0.0)                        # [B, 144]

    # ---- conv2: one MXU matmul, NO activation (last conv feeds the fp head) ----
    h2 = jnp.dot(h1, w2d_ref[...], preferred_element_type=jnp.float32) + b2d_ref[...]
    # h2: [B, 64], column layout = co*16 + p*4 + q

    # ---- compute_fp: spatial softmax feature points (vectorized) ----
    # A single global row-max is constant within each channel, so the
    # per-channel softmax is mathematically unchanged (shift invariance).
    m = jnp.max(h2, axis=1, keepdims=True)           # [B, 1]
    e = jnp.exp(h2 - m)                              # [B, 64]
    num8 = jnp.dot(e, fpnum_ref[...], preferred_element_type=jnp.float32)  # [B,8] fx0..3,fy0..3
    den8 = jnp.dot(e, fpden_ref[...], preferred_element_type=jnp.float32)  # [B,8] s0..3,s0..3
    fp8 = num8 / den8                                # exact divide (parity with torch softmax)

    # ---- fc_forward: ReLU on all but last layer (MXU matmuls) ----
    # fc1 split into fp-part + state-part so no lane concat is needed;
    # weight-row permutation for torch's interleaved fp order is baked in.
    h = (jnp.dot(fp8, fw1fp_ref[...], preferred_element_type=jnp.float32)
         + jnp.dot(state, fw1s_ref[...], preferred_element_type=jnp.float32)
         + fb1_ref[...])
    h = jnp.maximum(h, 0.0)
    h = jnp.dot(h, fw2_ref[...], preferred_element_type=jnp.float32) + fb2_ref[...]
    h = jnp.maximum(h, 0.0)
    out = jnp.dot(h, fw3_ref[...], preferred_element_type=jnp.float32) + fb3_ref[...]
    out_ref[...] = out.astype(out_ref.dtype)         # [B, 4]


def _torchnet_pallas(nn_input, kp):
    B = nn_input.shape[0]
    vmem = pl.BlockSpec(memory_space=pltpu.MemorySpace.VMEM)
    return pl.pallas_call(
        _torchnet_fused_kernel,
        out_shape=jax.ShapeDtypeStruct((B, OUT_DIM), jnp.float32),
        in_specs=[vmem] * 14,
        out_specs=vmem,
    )(nn_input,
      kp['w1d'], kp['b1d'], kp['w2d'], kp['b2d'],
      kp['fpnum'], kp['fpden'],
      kp['fw1_fp'], kp['fw1_s'], kp['fb1'],
      kp['fw2'], kp['fb2'], kp['fw3'], kp['fb3'])


@jax.jit
def torchnet_forward(nn_input, kp):
    """Forward pass mirroring TorchNet.forward for the config above.

    No wrapper-side reshape/transpose: the raw observation row goes straight
    into the fused kernel (the conv1 dense matrix absorbs the state offset)."""
    return _torchnet_pallas(nn_input, kp)


# ---------------- parameters ----------------
def init_params(key):
    """Torch-layout parameters (same as nn.Conv2d / nn.Linear would hold)."""
    keys = jax.random.split(key, 16)
    ki = 0
    params = {}

    conv = []
    cin = IMG_C
    for cout in NUM_FILTERS:
        w = 0.1 * jax.random.normal(
            keys[ki], (cout, cin, FILTER_SIZE, FILTER_SIZE), jnp.float32); ki += 1
        b = 0.1 * jax.random.normal(keys[ki], (cout,), jnp.float32); ki += 1
        conv.append((w, b))
        cin = cout
    params['conv'] = conv

    # fp maps: x_map[i,j] = (i - R/2)/R, y_map[i,j] = (j - C/2)/C
    R, C = FP_ROWS, FP_COLS
    ii = jnp.arange(R, dtype=jnp.float32).reshape(R, 1)
    jj = jnp.arange(C, dtype=jnp.float32).reshape(1, C)
    params['x_map'] = jnp.broadcast_to((ii - R / 2.0) / R, (R, C))
    params['y_map'] = jnp.broadcast_to((jj - C / 2.0) / C, (R, C))

    fc = []
    cur = FC_INPUT_DIM
    for hdim in [DIM_HIDDEN] * N_LAYERS + [OUT_DIM]:
        w = jax.random.normal(keys[ki], (hdim, cur), jnp.float32) / jnp.sqrt(cur); ki += 1
        b = 0.1 * jax.random.normal(keys[ki], (hdim,), jnp.float32); ki += 1
        fc.append((w, b))
        cur = hdim
    params['fc'] = fc
    return params


def prepare_params(params):
    """One-time re-layout: lower convs to dense matmul matrices, build the
    spatial-softmax weighted-sum matrices, and make FC weights matmul-ready.
    The forward never reshapes/transposes parameters or activations."""
    c1_out, c2_out = NUM_FILTERS
    (w1, b1), (w2, b2) = params['conv']
    w1 = np.asarray(w1); b1 = np.asarray(b1)
    w2 = np.asarray(w2); b2 = np.asarray(b2)

    # conv1 lowered to dense, consuming the RAW nn_input row:
    #   input col = 6 + w*(IMG_H*IMG_C) + h*IMG_C + c   (rows 0..5 = state, zero)
    #   output col = co*36 + i*6 + j                    (channel-major spatial)
    w1d = np.zeros((OBS_DIM, CONV1_DIM), np.float32)
    b1d = np.zeros((1, CONV1_DIM), np.float32)
    for co in range(c1_out):
        for i in range(CONV1_H):
            for j in range(CONV1_W):
                oc = co * (CONV1_H * CONV1_W) + i * CONV1_W + j
                b1d[0, oc] = b1[co]
                for c in range(IMG_C):
                    for di in range(FILTER_SIZE):
                        for dj in range(FILTER_SIZE):
                            ic = (STATE_DIM + (i + di) * (IMG_H * IMG_C)
                                  + (j + dj) * IMG_C + c)
                            w1d[ic, oc] = w1[co, c, di, dj]

    # conv2 lowered to dense: input col = c*36+i*6+j, output col = co*16+p*4+q
    w2d = np.zeros((CONV1_DIM, CONV2_DIM), np.float32)
    b2d = np.zeros((1, CONV2_DIM), np.float32)
    for co in range(c2_out):
        for p in range(CONV2_H):
            for q in range(CONV2_W):
                oc = co * (CONV2_H * CONV2_W) + p * CONV2_W + q
                b2d[0, oc] = b2[co]
                for c in range(c1_out):
                    for di in range(FILTER_SIZE):
                        for dj in range(FILTER_SIZE):
                            ic = (c * (CONV1_H * CONV1_W)
                                  + (p + di) * CONV1_W + (q + dj))
                            w2d[ic, oc] = w2[co, c, di, dj]

    # spatial-softmax weighted-sum matrices (conv2 col = co*16 + p*4 + q):
    #   fpnum cols 0..3 = fx numerators, cols 4..7 = fy numerators
    #   fpden cols 0..3 = per-channel sums, cols 4..7 = same sums (duplicated)
    x_map = np.asarray(params['x_map'])
    y_map = np.asarray(params['y_map'])
    fpnum = np.zeros((CONV2_DIM, 2 * NUM_FP), np.float32)
    fpden = np.zeros((CONV2_DIM, 2 * NUM_FP), np.float32)
    for co in range(NUM_FP):
        for p in range(CONV2_H):
            for q in range(CONV2_W):
                ic = co * (CONV2_H * CONV2_W) + p * CONV2_W + q
                fpnum[ic, co] = x_map[p, q]
                fpnum[ic, NUM_FP + co] = y_map[p, q]
                fpden[ic, co] = 1.0
                fpden[ic, NUM_FP + co] = 1.0

    # fc weights matmul-ready [K, N]; fc1 split + row-permuted so the kernel's
    # (fx0..fx3, fy0..fy3) feature order matches torch's interleaved order.
    (fcw1, fcb1), (fcw2, fcb2), (fcw3, fcb3) = params['fc']
    wt1 = np.asarray(fcw1).T                        # [14, 32], rows = input features
    perm = [0, 2, 4, 6, 1, 3, 5, 7]                 # (fx0..3, fy0..3) -> torch rows

    return {
        'w1d': jnp.asarray(w1d), 'b1d': jnp.asarray(b1d),
        'w2d': jnp.asarray(w2d), 'b2d': jnp.asarray(b2d),
        'fpnum': jnp.asarray(fpnum), 'fpden': jnp.asarray(fpden),
        'fw1_fp': jnp.asarray(wt1[perm, :]),
        'fw1_s': jnp.asarray(wt1[2 * NUM_FP:, :]),
        'fb1': jnp.asarray(np.asarray(fcb1).reshape(1, -1)),
        'fw2': jnp.asarray(np.asarray(fcw2).T),
        'fb2': jnp.asarray(np.asarray(fcb2).reshape(1, -1)),
        'fw3': jnp.asarray(np.asarray(fcw3).T),
        'fb3': jnp.asarray(np.asarray(fcb3).reshape(1, -1)),
    }


# ---------------- pure-JAX reference (sanity check, torch-layout params) ----------------
def _im2col(x, kh, kw):
    N, C, H, W = x.shape
    Ho, Wo = H - kh + 1, W - kw + 1
    cols = []
    for di in range(kh):
        for dj in range(kw):
            cols.append(x[:, :, di:di + Ho, dj:dj + Wo])
    p = jnp.stack(cols, axis=2)                           # [N, C, kh*kw, Ho, Wo]
    p = p.transpose(0, 3, 4, 1, 2).reshape(N * Ho * Wo, C * kh * kw)
    return p


def reference_forward(nn_input, params):
    n = nn_input.shape[0]
    state = nn_input[:, :STATE_DIM]
    x = nn_input[:, STATE_DIM:].reshape(n, IMG_W, IMG_H, IMG_C).transpose(0, 3, 1, 2)
    convs = params['conv']
    for li, (w, b) in enumerate(convs):
        Ho = x.shape[2] - FILTER_SIZE + 1
        Wo = x.shape[3] - FILTER_SIZE + 1
        y = _im2col(x, FILTER_SIZE, FILTER_SIZE) @ w.reshape(w.shape[0], -1).T + b
        y = y.reshape(n, Ho, Wo, w.shape[0]).transpose(0, 3, 1, 2)
        if li < len(convs) - 1:
            y = jnp.maximum(y, 0.0)
        x = y
    num_fp = x.shape[1]
    feats = x.reshape(n * num_fp, -1)
    p = jax.nn.softmax(feats, axis=1)
    x_map = params['x_map'].reshape(1, -1)
    y_map = params['y_map'].reshape(1, -1)
    fx = jnp.sum(x_map * p, axis=1, keepdims=True)
    fy = jnp.sum(y_map * p, axis=1, keepdims=True)
    h = jnp.concatenate(
        [jnp.concatenate([fx, fy], axis=1).reshape(n, num_fp * 2), state], axis=1)
    for li, (w, b) in enumerate(params['fc']):
        h = h @ w.T + b
        if li < len(params['fc']) - 1:
            h = jnp.maximum(h, 0.0)
    return h


if __name__ == "__main__":
    key = jax.random.PRNGKey(0)
    k_obs, k_par = jax.random.split(key)
    nn_input = jax.random.normal(k_obs, (BATCH, OBS_DIM), jnp.float32)
    params = init_params(k_par)
    kparams = prepare_params(params)

    out = torchnet_forward(nn_input, kparams)
    out = jax.block_until_ready(out)

    assert out.shape == (BATCH, OUT_DIM), out.shape
    assert bool(jnp.all(jnp.isfinite(out)))
    ref = reference_forward(nn_input, params)
    assert bool(jnp.allclose(out, ref, rtol=1e-2, atol=1e-2)), (
        float(jnp.max(jnp.abs(out - ref))))
    print("KERNEL_OK")
</pallas_src>

<mosaic_0001>
module attributes {stable_mosaic.version = 11 : i64} {
  func.func @_torchnet_fused_kernel(%arg0: memref<2x198xf32, #tpu.memory_space<vmem>>, %arg1: memref<198x144xf32, #tpu.memory_space<vmem>>, %arg2: memref<1x144xf32, #tpu.memory_space<vmem>>, %arg3: memref<144x64xf32, #tpu.memory_space<vmem>>, %arg4: memref<1x64xf32, #tpu.memory_space<vmem>>, %arg5: memref<64x8xf32, #tpu.memory_space<vmem>>, %arg6: memref<64x8xf32, #tpu.memory_space<vmem>>, %arg7: memref<8x32xf32, #tpu.memory_space<vmem>>, %arg8: memref<6x32xf32, #tpu.memory_space<vmem>>, %arg9: memref<1x32xf32, #tpu.memory_space<vmem>>, %arg10: memref<32x32xf32, #tpu.memory_space<vmem>>, %arg11: memref<1x32xf32, #tpu.memory_space<vmem>>, %arg12: memref<32x4xf32, #tpu.memory_space<vmem>>, %arg13: memref<1x4xf32, #tpu.memory_space<vmem>>, %arg14: memref<2x4xf32, #tpu.memory_space<vmem>>) attributes {dimension_semantics = [], scalar_prefetch = 0 : i64, scratch_operands = 0 : i64, tpu.core_type = #tpu.core_type<tc>} {
    %c0 = arith.constant 0 : index
    %c0_0 = arith.constant 0 : index
    %0 = vector.load %arg0[%c0, %c0_0] : memref<2x198xf32, #tpu.memory_space<vmem>>, vector<2x198xf32>
    %1 = vector.extract_strided_slice %0 {offsets = [0, 0], sizes = [2, 6], strides = [1, 1]} : vector<2x198xf32> to vector<2x6xf32>
    %c0_1 = arith.constant 0 : index
    %c0_2 = arith.constant 0 : index
    %2 = vector.load %arg1[%c0_1, %c0_2] : memref<198x144xf32, #tpu.memory_space<vmem>>, vector<198x144xf32>
    %cst = arith.constant dense<0.000000e+00> : vector<2x144xf32>
    %3 = tpu.matmul %0, %2, %cst {dimension_numbers = #tpu.dot_dimension_numbers<[1], [0], [0], [1], [0, 0, 1, 1], [], []>} : vector<2x198xf32>, vector<198x144xf32>, vector<2x144xf32> -> vector<2x144xf32>
    %c0_3 = arith.constant 0 : index
    %c0_4 = arith.constant 0 : index
    %4 = vector.load %arg2[%c0_3, %c0_4] : memref<1x144xf32, #tpu.memory_space<vmem>>, vector<1x144xf32>
    %5 = vector.broadcast %4 : vector<1x144xf32> to vector<2x144xf32>
    %6 = arith.addf %3, %5 : vector<2x144xf32>
    %cst_5 = arith.constant 0.000000e+00 : f32
    %7 = vector.broadcast %cst_5 : f32 to vector<2x144xf32>
    %8 = arith.maximumf %6, %7 : vector<2x144xf32>
    %c0_6 = arith.constant 0 : index
    %c0_7 = arith.constant 0 : index
    %9 = vector.load %arg3[%c0_6, %c0_7] : memref<144x64xf32, #tpu.memory_space<vmem>>, vector<144x64xf32>
    %cst_8 = arith.constant dense<0.000000e+00> : vector<2x64xf32>
    %10 = tpu.matmul %8, %9, %cst_8 {dimension_numbers = #tpu.dot_dimension_numbers<[1], [0], [0], [1], [0, 0, 1, 1], [], []>} : vector<2x144xf32>, vector<144x64xf32>, vector<2x64xf32> -> vector<2x64xf32>
    %c0_9 = arith.constant 0 : index
    %c0_10 = arith.constant 0 : index
    %11 = vector.load %arg4[%c0_9, %c0_10] : memref<1x64xf32, #tpu.memory_space<vmem>>, vector<1x64xf32>
    %12 = vector.broadcast %11 : vector<1x64xf32> to vector<2x64xf32>
    %13 = arith.addf %10, %12 : vector<2x64xf32>
    %cst_11 = arith.constant dense<0xFF800000> : vector<2xf32>
    %14 = vector.multi_reduction <maximumf>, %13, %cst_11 [1] : vector<2x64xf32> to vector<2xf32>
    %15 = vector.shape_cast %14 : vector<2xf32> to vector<2x1xf32>
    %16 = vector.broadcast %15 : vector<2x1xf32> to vector<2x64xf32>
    %17 = arith.subf %13, %16 : vector<2x64xf32>
    %18 = math.exp %17 : vector<2x64xf32>
    %c0_12 = arith.constant 0 : index
    %c0_13 = arith.constant 0 : index
    %19 = vector.load %arg5[%c0_12, %c0_13] : memref<64x8xf32, #tpu.memory_space<vmem>>, vector<64x8xf32>
    %cst_14 = arith.constant dense<0.000000e+00> : vector<2x8xf32>
    %20 = tpu.matmul %18, %19, %cst_14 {dimension_numbers = #tpu.dot_dimension_numbers<[1], [0], [0], [1], [0, 0, 1, 1], [], []>} : vector<2x64xf32>, vector<64x8xf32>, vector<2x8xf32> -> vector<2x8xf32>
    %c0_15 = arith.constant 0 : index
    %c0_16 = arith.constant 0 : index
    %21 = vector.load %arg6[%c0_15, %c0_16] : memref<64x8xf32, #tpu.memory_space<vmem>>, vector<64x8xf32>
    %cst_17 = arith.constant dense<0.000000e+00> : vector<2x8xf32>
    %22 = tpu.matmul %18, %21, %cst_17 {dimension_numbers = #tpu.dot_dimension_numbers<[1], [0], [0], [1], [0, 0, 1, 1], [], []>} : vector<2x64xf32>, vector<64x8xf32>, vector<2x8xf32> -> vector<2x8xf32>
    %23 = arith.divf %20, %22 : vector<2x8xf32>
    %c0_18 = arith.constant 0 : index
    %c0_19 = arith.constant 0 : index
    %24 = vector.load %arg7[%c0_18, %c0_19] : memref<8x32xf32, #tpu.memory_space<vmem>>, vector<8x32xf32>
    %cst_20 = arith.constant dense<0.000000e+00> : vector<2x32xf32>
    %25 = tpu.matmul %23, %24, %cst_20 {dimension_numbers = #tpu.dot_dimension_numbers<[1], [0], [0], [1], [0, 0, 1, 1], [], []>} : vector<2x8xf32>, vector<8x32xf32>, vector<2x32xf32> -> vector<2x32xf32>
    %c0_21 = arith.constant 0 : index
    %c0_22 = arith.constant 0 : index
    %26 = vector.load %arg8[%c0_21, %c0_22] : memref<6x32xf32, #tpu.memory_space<vmem>>, vector<6x32xf32>
    %cst_23 = arith.constant dense<0.000000e+00> : vector<2x32xf32>
    %27 = tpu.matmul %1, %26, %cst_23 {dimension_numbers = #tpu.dot_dimension_numbers<[1], [0], [0], [1], [0, 0, 1, 1], [], []>} : vector<2x6xf32>, vector<6x32xf32>, vector<2x32xf32> -> vector<2x32xf32>
    %28 = arith.addf %25, %27 : vector<2x32xf32>
    %c0_24 = arith.constant 0 : index
    %c0_25 = arith.constant 0 : index
    %29 = vector.load %arg9[%c0_24, %c0_25] : memref<1x32xf32, #tpu.memory_space<vmem>>, vector<1x32xf32>
    %30 = vector.broadcast %29 : vector<1x32xf32> to vector<2x32xf32>
    %31 = arith.addf %28, %30 : vector<2x32xf32>
    %cst_26 = arith.constant 0.000000e+00 : f32
    %32 = vector.broadcast %cst_26 : f32 to vector<2x32xf32>
    %33 = arith.maximumf %31, %32 : vector<2x32xf32>
    %c0_27 = arith.constant 0 : index
    %c0_28 = arith.constant 0 : index
    %34 = vector.load %arg10[%c0_27, %c0_28] : memref<32x32xf32, #tpu.memory_space<vmem>>, vector<32x32xf32>
    %cst_29 = arith.constant dense<0.000000e+00> : vector<2x32xf32>
    %35 = tpu.matmul %33, %34, %cst_29 {dimension_numbers = #tpu.dot_dimension_numbers<[1], [0], [0], [1], [0, 0, 1, 1], [], []>} : vector<2x32xf32>, vector<32x32xf32>, vector<2x32xf32> -> vector<2x32xf32>
    %c0_30 = arith.constant 0 : index
    %c0_31 = arith.constant 0 : index
    %36 = vector.load %arg11[%c0_30, %c0_31] : memref<1x32xf32, #tpu.memory_space<vmem>>, vector<1x32xf32>
    %37 = vector.broadcast %36 : vector<1x32xf32> to vector<2x32xf32>
    %38 = arith.addf %35, %37 : vector<2x32xf32>
    %cst_32 = arith.constant 0.000000e+00 : f32
    %39 = vector.broadcast %cst_32 : f32 to vector<2x32xf32>
    %40 = arith.maximumf %38, %39 : vector<2x32xf32>
    %c0_33 = arith.constant 0 : index
    %c0_34 = arith.constant 0 : index
    %41 = vector.load %arg12[%c0_33, %c0_34] : memref<32x4xf32, #tpu.memory_space<vmem>>, vector<32x4xf32>
    %cst_35 = arith.constant dense<0.000000e+00> : vector<2x4xf32>
    %42 = tpu.matmul %40, %41, %cst_35 {dimension_numbers = #tpu.dot_dimension_numbers<[1], [0], [0], [1], [0, 0, 1, 1], [], []>} : vector<2x32xf32>, vector<32x4xf32>, vector<2x4xf32> -> vector<2x4xf32>
    %c0_36 = arith.constant 0 : index
    %c0_37 = arith.constant 0 : index
    %43 = vector.load %arg13[%c0_36, %c0_37] : memref<1x4xf32, #tpu.memory_space<vmem>>, vector<1x4xf32>
    %44 = vector.broadcast %43 : vector<1x4xf32> to vector<2x4xf32>
    %45 = arith.addf %42, %44 : vector<2x4xf32>
    %c0_38 = arith.constant 0 : index
    %c0_39 = arith.constant 0 : index
    %46 = vector.load %arg14[%c0_38, %c0_39] : memref<2x4xf32, #tpu.memory_space<vmem>>, vector<2x4xf32>
    tpu.vector_store %arg14[%c0_38, %c0_39], %45 {strides = array<i32>} : memref<2x4xf32, #tpu.memory_space<vmem>>, vector<2x4xf32>,
    return
  }
}

</mosaic_0001>

<bundles_post_ra>
// kernel: torchnet_forward.1
= control target key start
LH: loop header
LB: loop body
LE: loop exit
PB: predicated region body
PF: predicated region fallthrough
CT: control target
= control target key end

     0   :  { %v966_v5 = vmov 0.0   ;;  %v101_v9 = vlaneseq  ;;  %v967_v10 = vmov 1983009808   ;;  %vm121_vm0 = vcmask 572416   ;;  %s1423_s0 = inlined_call_operand.vmem [shape: f32[2,198], index: 0, kind: input, shape index: {}]   ;;  %s1424_s1 = inlined_call_operand.vmem [shape: f32[198,144], index: 1, kind: input, shape index: {}]   ;;  %s1425_s2 = inlined_call_operand.vmem [shape: f32[1,144], index: 2, kind: input, shape index: {}]   ;;  %s1426_s3 = inlined_call_operand.vmem [shape: f32[144,64], index: 3, kind: input, shape index: {}]   ;;  %s1427_s4 = inlined_call_operand.vmem [shape: f32[1,64], index: 4, kind: input, shape index: {}]   ;;  %s1428_s5 = inlined_call_operand.vmem [shape: f32[64,8], index: 5, kind: input, shape index: {}]   ;;  %s1429_s6 = inlined_call_operand.vmem [shape: f32[64,8], index: 6, kind: input, shape index: {}]   ;;  %s1430_s7 = inlined_call_operand.vmem [shape: f32[8,32], index: 7, kind: input, shape index: {}]   ;;  %s1431_s8 = inlined_call_operand.vmem [shape: f32[6,32], index: 8, kind: input, shape index: {}]   ;;  %s1432_s9 = inlined_call_operand.vmem [shape: f32[1,32], index: 9, kind: input, shape index: {}]   ;;  %s1433_s10 = inlined_call_operand.vmem [shape: f32[32,32], index: 10, kind: input, shape index: {}]   ;;  %s1434_s11 = inlined_call_operand.vmem [shape: f32[1,32], index: 11, kind: input, shape index: {}]   ;;  %s1435_s12 = inlined_call_operand.vmem [shape: f32[32,4], index: 12, kind: input, shape index: {}]   ;;  %s1436_s13 = inlined_call_operand.vmem [shape: f32[1,4], index: 13, kind: input, shape index: {}]   ;;  %s1437_s14 = inlined_call_operand.hbm [shape: f32[2,4], index: 14, kind: output, shape index: {}]  }
   0x1   :  { %v80_v0 = vld [vmem:[%s1424_s1 + $0xf8] sm:$0xff]  ;;  %v79_v1 = vld [vmem:[%s1424_s1 + $0xf0] sm:$0xff]  ;;  %v78_v2 = vld [vmem:[%s1424_s1 + $0xe8] sm:$0xff]  ;;  %233 = vmatprep.subr.mxu1 %v966_v5  ;;  %v113_v11 = vunpack.c.l.s4 %v967_v10 }
   0x2   :  { %131 = vmatprep.subr.mxu0 %v80_v0  ;;  %v77_v3 = vld [vmem:[%s1424_s1 + $0xe0] sm:$0xff]  ;;  %v76_v4 = vld [vmem:[%s1424_s1 + $0xd8] sm:$0xff]  ;;  %v75_v6 = vld [vmem:[%s1424_s1 + $0xd0] sm:$0xff]  ;;  %v1082_v16 = vshrl.u32 %v101_v9, 7 }
   0x3   :  { %132 = vmatpush1.msra.mxu0 %v79_v1  ;;  %v74_v7 = vld [vmem:[%s1424_s1 + $0xc8] sm:$0xff]  ;;  %v73_v8 = vld [vmem:[%s1424_s1 + $0xc0] sm:$0xff]  ;;  %v72_v12 = vld [vmem:[%s1424_s1 + $0xb8] sm:$0xff]  ;;  %v114_v17 = vunpack.c.0.s8 %v113_v11 }
   0x4   :  { %133 = vmatprep.subr.mxu0 %v78_v2  ;;  %v71_v13 = vld [vmem:[%s1424_s1 + $0xb0] sm:$0xff]  ;;  %v70_v14 = vld [vmem:[%s1424_s1 + $0xa8] sm:$0xff]  ;;  %v69_v15 = vld [vmem:[%s1424_s1 + $0xa0] sm:$0xff] }
   0x5   :  { %134 = vmatpush1.msra.mxu0 %v77_v3  ;;  %v68_v18 = vld [vmem:[%s1424_s1 + $0x98] sm:$0xff]  ;;  %v67_v19 = vld [vmem:[%s1424_s1 + $0x90] sm:$0xff]  ;;  %v66_v20 = vld [vmem:[%s1424_s1 + $0x88] sm:$0xff]  ;;  %v117_v22 = vsub.s32 %v114_v17, %v1082_v16 }
   0x6   :  { %135 = vmatprep.subr.mxu0 %v76_v4  ;;  %v65_v21 = vld [vmem:[%s1424_s1 + $0x80] sm:$0xff]  ;;  %v64_v23 = vld [vmem:[%s1424_s1 + $0x78] sm:$0xff]  ;;  %v63_v24 = vld [vmem:[%s1424_s1 + $0x70] sm:$0xff] }
   0x7   :  { %136 = vmatpush1.msra.mxu0 %v75_v6  ;;  %v62_v25 = vld [vmem:[%s1424_s1 + $0x68] sm:$0xff]  ;;  %v1109_v26 = vld [vmem:[%s1423_s0] sm:$0xf]  ;;  %v219_v29 = vld [vmem:[%s1426_s3 + $0x78] sm:$0xff] }
   0x8   :  { %137 = vmatprep.subr.mxu0 %v74_v7  ;;  %v61_v27 = vld [vmem:[%s1424_s1 + $0x60] sm:$0xff]  ;;  %v1115_v28 = vrot.slane %v1109_v26, %v117_v22  ;;  %v218_v30 = vld [vmem:[%s1426_s3 + $0x70] sm:$0xff]  ;;  %v60_v31 = vld [vmem:[%s1424_s1 + $0x58] sm:$0xff]  ;;  %234 = vmatpush1.msra.mxu1 %v219_v29 }
   0x9   :  { %138 = vmatpush1.msra.mxu0 %v73_v8  ;;  %v59_v32 = vld [vmem:[%s1424_s1 + $0x50] sm:$0xff]  ;;  %235 = vmatprep.subr.mxu1 %v966_v5  ;;  %v58_v34 = vld [vmem:[%s1424_s1 + $0x48] sm:$0xff]  ;;  %v57_v36 = vld [vmem:[%s1424_s1 + $0x40] sm:$0xff] }
   0xa   :  { %139 = vmatprep.subr.mxu0 %v72_v12  ;;  %v119_v33 = vcombine.high %v1115_v28, %v1115_v28  ;;  %236 = vmatpush1.msra.mxu1 %v218_v30  ;;  %v217_v35 = vld [vmem:[%s1426_s3 + $0x68] sm:$0xff]  ;;  %v56_v37 = vld [vmem:[%s1424_s1 + $0x38] sm:$0xff]  ;;  %v216_v38 = vld [vmem:[%s1426_s3 + $0x60] sm:$0xff] }
   0xb   :  { %140 = vmatpush1.msra.mxu0 %v71_v13  ;;  %237 = vmatprep.subr.mxu1 %v966_v5 }
   0xc   :  { %141 = vmatprep.subr.mxu0 %v70_v14  ;;  %821 = vmatprep.mubr.msk.f32.mxu0 %vm121_vm0, %v119_v33 }
   0xd   :  { %142 = vmatpush1.msra.mxu0 %v69_v15 }
   0xe   :  { %143 = vmatprep.subr.mxu0 %v68_v18 }
   0xf   :  { %144 = vmatpush1.msra.mxu0 %v67_v19 }
  0x10   :  { %145 = vmatprep.subr.mxu0 %v66_v20 }
  0x11   :  { %146 = vmatpush1.msra.mxu0 %v65_v21 }
  0x12   :  { %147 = vmatprep.subr.mxu0 %v64_v23 }
  0x13   :  { %148 = vmatpush1.msra.mxu0 %v63_v24 }
  0x14   :  { %149 = vmatprep.subr.mxu0 %v62_v25 }
  0x15   :  { %150 = vmatpush1.msra.mxu0 %v61_v27 }
  0x16   :  { %151 = vmatprep.subr.mxu0 %v60_v31 }
  0x17   :  { %152 = vmatpush1.msra.mxu0 %v59_v32 }
  0x18   :  { %19 = vsyncpa [#allocation3], 0  ;;  %153 = vmatprep.subr.mxu0 %v58_v34  ;;  %v55_v39 = vld [vmem:[%s1424_s1 + $0x30] sm:$0xff]  ;;  %238 = vmatpush1.msra.mxu1 %v217_v35  ;;  %v54_v40 = vld [vmem:[%s1424_s1 + $0x28] sm:$0xff]  ;;  %vm124_vm1 = vcmask 1045504   ;;  %v103_v15 = vsub.s32 0, %v1082_v16 }
  0x19   :  { %154 = vmatpush1.msra.mxu0 %v57_v36  ;;  %239 = vmatprep.subr.mxu1 %v966_v5  ;;  %v215_v41 = vld [vmem:[%s1426_s3 + $0x58] sm:$0xff]  ;;  %v53_v42 = vld [vmem:[%s1424_s1 + $0x20] sm:$0xff]  ;;  %v214_v44 = vld [vmem:[%s1426_s3 + $0x50] sm:$0xff]  ;;  %v107_v18 = vsub.s32 1, %v1082_v16  ;;  %vm229_vm2 = vcmask 130048   ;;  %vm303_vm3 = vcmask 517120  }
  0x1a   :  { %155 = vmatprep.subr.mxu0 %v56_v37  ;;  %240 = vmatpush1.msra.mxu1 %v216_v38  ;;  %v52_v43 = vld [vmem:[%s1424_s1 + $0x18] sm:$0xff]  ;;  %v51_v45 = vld [vmem:[%s1424_s1 + $0x10] sm:$0xff]  ;;  %v50_v46 = vld [vmem:[%s1424_s1 + $0x8] sm:$0xff]  ;;  %vm968_vm4 = vmmov 0   ;;  %vm318_vm5 = vcmask 523264   ;;  %vm474_vm6 = vcmask 48128  }
  0x1b   :  { %156 = vmatpush1.msra.mxu0 %v55_v39  ;;  %241 = vmatprep.subr.mxu1 %v966_v5  ;;  %v213_v47 = vld [vmem:[%s1426_s3 + $0x48] sm:$0xff]  ;;  %v49_v48 = vld [vmem:[%s1424_s1] sm:$0xff]  ;;  %v96_v52 = vld [vmem:[%s1424_s1 + $0x178] sm:$0xff]  ;;  %vm550_vm7 = vcmask 64512   ;;  %vm644_vm8 = vcmask 261120   ;;  %s969_s27 = smov [#allocation2]  }
  0x1c   :  { %157 = vmatprep.subr.mxu0 %v54_v40  ;;  %242 = vmatpush1.msra.mxu1 %v215_v41  ;;  %v98_v49 = vld [vmem:[%s1424_s1 + $0x188] sm:$0x3f]  ;;  %v212_v50 = vld [vmem:[%s1426_s3 + $0x40] sm:$0xff]  ;;  %v211_v53 = vld [vmem:[%s1426_s3 + $0x38] sm:$0xff]  ;;  %vm803_vm9 = vcmask 25600  }
  0x1d   :  { %158 = vmatpush1.msra.mxu0 %v53_v42  ;;  %243 = vmatprep.subr.mxu1 %v966_v5  ;;  %v97_v51 = vld [vmem:[%s1424_s1 + $0x180] sm:$0x3f]  ;;  %v95_v54 = vld [vmem:[%s1424_s1 + $0x170] sm:$0xff]  ;;  %v94_v55 = vld [vmem:[%s1424_s1 + $0x168] sm:$0xff] }
  0x1e   :  { %159 = vmatprep.subr.mxu0 %v52_v43  ;;  %244 = vmatpush1.msra.mxu1 %v214_v44  ;;  %v210_v56 = vld [vmem:[%s1426_s3 + $0x30] sm:$0xff]  ;;  %v93_v57 = vld [vmem:[%s1424_s1 + $0x160] sm:$0xff]  ;;  %v92_v58 = vld [vmem:[%s1424_s1 + $0x158] sm:$0xff] }
  0x1f   :  { %160 = vmatpush1.msra.mxu0 %v51_v45  ;;  %245 = vmatprep.subr.mxu1 %v966_v5  ;;  %v209_v59 = vld [vmem:[%s1426_s3 + $0x28] sm:$0xff]  ;;  %v91_v60 = vld [vmem:[%s1424_s1 + $0x150] sm:$0xff]  ;;  %v208_v62 = vld [vmem:[%s1426_s3 + $0x20] sm:$0xff] }
  0x20   :  { %161 = vmatprep.subr.mxu0 %v50_v46  ;;  %246 = vmatpush1.msra.mxu1 %v213_v47  ;;  %v90_v61 = vld [vmem:[%s1424_s1 + $0x148] sm:$0xff]  ;;  %v89_v63 = vld [vmem:[%s1424_s1 + $0x140] sm:$0xff]  ;;  %v88_v0 = vld [vmem:[%s1424_s1 + $0x138] sm:$0xff] }
  0x21   :  { %162 = vmatpush1.msra.mxu0 %v49_v48  ;;  %247 = vmatprep.subr.mxu1 %v966_v5  ;;  %v207_v1 = vld [vmem:[%s1426_s3 + $0x18] sm:$0xff]  ;;  %v87_v2 = vld [vmem:[%s1424_s1 + $0x130] sm:$0xff]  ;;  %v86_v3 = vld [vmem:[%s1424_s1 + $0x128] sm:$0xff] }
  0x22   :  { %819 = vmatprep.subr.msk.mxu0 %vm124_vm1, %v98_v49  ;;  %248 = vmatpush1.msra.mxu1 %v212_v50  ;;  %v206_v4 = vld [vmem:[%s1426_s3 + $0x10] sm:$0xff]  ;;  %v85_v6 = vld [vmem:[%s1424_s1 + $0x120] sm:$0xff]  ;;  %v84_v7 = vld [vmem:[%s1424_s1 + $0x118] sm:$0xff] }
  0x23   :  { %820 = vmatpush2.msk.msra.mxu0 %vm124_vm1, %v97_v51  ;;  %249 = vmatprep.subr.mxu1 %v966_v5  ;;  %v83_v8 = vld [vmem:[%s1424_s1 + $0x110] sm:$0xff]  ;;  %v82_v9 = vld [vmem:[%s1424_s1 + $0x108] sm:$0xff]  ;;  %v81_v10 = vld [vmem:[%s1424_s1 + $0x100] sm:$0xff] }
  0x24   :  { %179 = vmatprep.subr.mxu0 %v96_v52  ;;  %250 = vmatpush1.msra.mxu1 %v211_v53  ;;  %v205_v11 = vld [vmem:[%s1426_s3 + $0x8] sm:$0xff]  ;;  %v204_v12 = vld [vmem:[%s1426_s3] sm:$0xff]  ;;  %v317_v32 = vld [vmem:[%s1428_s5 + $0x38] sm:$0xff] }
  0x25   :  { %180 = vmatpush2.msra.mxu0 %v95_v54  ;;  %251 = vmatprep.subr.mxu1 %v966_v5  ;;  %v221_v13 = vld [vmem:[%s1426_s3 + $0x88] sm:$0xff]  ;;  %v220_v14 = vld [vmem:[%s1426_s3 + $0x80] sm:$0xff]  ;;  %v399_v33 = vld [vmem:[%s1429_s6 + $0x38] sm:$0xff] }
  0x26   :  { %181 = vmatprep.subr.mxu0 %v94_v55  ;;  %252 = vmatpush1.msra.mxu1 %v210_v56  ;;  %v99_v17 = vld [vmem:[%s1425_s2] sm:$0x3]  ;;  %v316_v34 = vld [vmem:[%s1428_s5 + $0x30] sm:$0xff]  ;;  %v315_v36 = vld [vmem:[%s1428_s5 + $0x28] sm:$0xff] }
  0x27   :  { %182 = vmatpush2.msra.mxu0 %v93_v57  ;;  %253 = vmatprep.subr.mxu1 %v966_v5  ;;  %v104_v19 = vrot.slane %v99_v17, %v103_v15  ;;  %v108_v20 = vrot.slane %v99_v17, %v107_v18  ;;  %v398_v35 = vld [vmem:[%s1429_s6 + $0x30] sm:$0xff]  ;;  %v397_v37 = vld [vmem:[%s1429_s6 + $0x28] sm:$0xff]  ;;  %v314_v38 = vld [vmem:[%s1428_s5 + $0x20] sm:$0xff] }
  0x28   :  { %183 = vmatprep.subr.mxu0 %v92_v58  ;;  %254 = vmatpush1.msra.mxu1 %v209_v59  ;;  %v396_v39 = vld [vmem:[%s1429_s6 + $0x20] sm:$0xff]  ;;  %v313_v40 = vld [vmem:[%s1428_s5 + $0x18] sm:$0xff]  ;;  %v312_v42 = vld [vmem:[%s1428_s5 + $0x10] sm:$0xff] }
  0x29   :  { %184 = vmatpush2.msra.mxu0 %v91_v60  ;;  %255 = vmatprep.subr.mxu1 %v966_v5  ;;  %v395_v41 = vld [vmem:[%s1429_s6 + $0x18] sm:$0xff]  ;;  %v394_v43 = vld [vmem:[%s1429_s6 + $0x10] sm:$0xff]  ;;  %v311_v44 = vld [vmem:[%s1428_s5 + $0x8] sm:$0xff] }
  0x2a   :  { %185 = vmatprep.subr.mxu0 %v90_v61  ;;  %256 = vmatpush1.msra.mxu1 %v208_v62  ;;  %v393_v45 = vld [vmem:[%s1429_s6 + $0x8] sm:$0xff]  ;;  %v310_v46 = vld [vmem:[%s1428_s5] sm:$0xff]  ;;  %v636_v61 = vld [vmem:[%s1433_s10 + $0x18] sm:$0xff]  ;;  %s811_s5 = sshll.u32 %s969_s27, 4  ;;  %s812_s5 = int_to_ptr.vmem [resolvable:$true] %s811_s5 }
  0x2b   :  { %186 = vmatpush2.msra.mxu0 %v89_v63  ;;  %257 = vmatprep.subr.mxu1 %v966_v5  ;;  %v392_v47 = vld [vmem:[%s1429_s6] sm:$0xff]  ;;  %v635_v62 = vld [vmem:[%s1433_s10 + $0x10] sm:$0xff]  ;;  %v634_v63 = vld [vmem:[%s1433_s10 + $0x8] sm:$0xff]  ;;  %p949_p1 = scmp.lt.s32.totalorder %s812_s5, %s812_s5 }
  0x2c   :  { %187 = vmatprep.subr.mxu0 %v88_v0  ;;  %258 = vmatpush1.msra.mxu1 %v207_v1  ;;  %v473_v52 = vld [vmem:[%s1431_s8] sm:$0x3f]  ;;  %v722_v1 = vld [vmem:[%s1435_s12 + $0x18] sm:$0xff] }
  0x2d   :  { %188 = vmatpush2.msra.mxu0 %v87_v2  ;;  %259 = vmatprep.subr.mxu1 %v966_v5  ;;  %v472_v53 = vld [vmem:[%s1430_s7] sm:$0xff] }
  0x2e   :  { %189 = vmatprep.subr.mxu0 %v86_v3  ;;  %260 = vmatpush1.msra.mxu1 %v206_v4  ;;  %v633_v0 = vld [vmem:[%s1433_s10] sm:$0xff] }
  0x2f   :  { %190 = vmatpush2.msra.mxu0 %v85_v6  ;;  %261 = vmatprep.subr.mxu1 %v966_v5  ;;  %v829_v3 = vld [vmem:[%s1432_s9] ss:$0 sm:$0xff] }
  0x30   :  { %191 = vmatprep.subr.mxu0 %v84_v7  ;;  %262 = vmatpush1.msra.mxu1 %v205_v11  ;;  %v719_v11 = vld [vmem:[%s1435_s12] sm:$0xff] }
  0x31   :  { %192 = vmatpush2.msra.mxu0 %v83_v8  ;;  %263 = vmatprep.subr.mxu1 %v966_v5  ;;  %v832_v18 = vld [vmem:[%s1436_s13] ss:$0 sm:$0xff] }
  0x32   :  { %193 = vmatprep.subr.mxu0 %v82_v9  ;;  %264 = vmatpush1.msra.mxu1 %v204_v12  ;;  %v721_v9 = vld [vmem:[%s1435_s12 + $0x10] sm:$0xff]  ;;  %v830_v12 = vld [vmem:[%s1434_s11] ss:$0 sm:$0xff] }
  0x33   :  { %194 = vmatpush2.msra.mxu0 %v81_v10  ;;  %293 = vmatprep.subr.mxu1 %v966_v5  ;;  %v720_v10 = vld [vmem:[%s1435_s12 + $0x8] sm:$0xff]  ;;  %s944_s12 = scalar_lea.vmem %s812_s5, 32 }
  0x34   :  { %196 = vmatmul.mubr.f32.vlgmr.msra.gmra.mxu0 %v1115_v28  ;;  %885 = vmatprep.subr.mxu0 %v966_v5  ;;  %v822_v28 = vld [vmem:[%s1427_s4] ss:$0 sm:$0xff]  ;;  %p945_p0 = scmp.ne.s32.totalorder %s812_s5, %s944_s12  ;;  %p950_p2 = scmp.lt.s32.totalorder %s944_s12, %s944_s12 }
  0x35   :  { %294 = vmatpush2.msra.mxu1 %v221_v13  ;;  %886 = vmatpush3.msra.mxu0 %v399_v33 }
  0x36   :  { %295 = vmatprep.subr.mxu1 %v966_v5  ;;  %887 = vmatprep.subr.mxu0 %v966_v5  ;;  %p951_p3 = por %p950_p2, %p949_p1 }
  0x37   :  { %296 = vmatpush2.msra.mxu1 %v220_v14  ;;  %888 = vmatpush3.msra.mxu0 %v398_v35 }
  0x38   :  { %866 = vmatprep.subr.mxu1 %v966_v5  ;;  %889 = vmatprep.subr.mxu0 %v966_v5  ;;  %p952_p4 = pnand %p951_p3, %p945_p0 }
  0x39   :  { %890 = vmatpush3.msra.mxu0 %v397_v37  ;;  %901 = vmatprep.mubr.msk.f32.mxu0 %vm968_vm4, %v966_v5 }
  0x3a   :  { %891 = vmatprep.subr.mxu0 %v966_v5 }
  0x3b   :  { %892 = vmatpush3.msra.mxu0 %v396_v39 }
  0x3c   :  { %893 = vmatprep.subr.mxu0 %v966_v5 }
  0x3d   :  { %894 = vmatpush3.msra.mxu0 %v395_v41 }
  0x3e   :  { %895 = vmatprep.subr.mxu0 %v966_v5 }
  0x3f   :  { %896 = vmatpush3.msra.mxu0 %v394_v43 }
  0x40   :  { %897 = vmatprep.subr.mxu0 %v966_v5 }
  0x41   :  { %898 = vmatpush3.msra.mxu0 %v393_v45 }
  0x42   :  { %899 = vmatprep.subr.mxu0 %v966_v5 }
  0x43   :  { %900 = vmatpush3.msra.mxu0 %v392_v47 }
  0x44   :  { %925 = vmatprep.subr.mxu0 %v966_v5 }
  0xf4   :  { %v197_v21 = vpop.f32.mrf.mxu0 }
  0xf5   :  { %v198_v22 = vadd.f32 %v197_v21, %v104_v19 }
  0xf6   :  { %v199_v23 = vpop.f32.mrf.mxu0 }
  0xf7   :  { %v200_v24 = vadd.f32 %v199_v23, %v108_v20  ;;  %v202_v27 = vmax.f32 %v198_v22, 0.0 }
  0xf9   :  { %v203_v25 = vmax.f32 %v200_v24, 0.0 }
  0xfb   :  { %823 = vmatprep.mubr.msk.f32.mxu1 %vm229_vm2, %v203_v25 }
  0xfc   :  { %298 = vmatmul.mubr.f32.vlgmr.msra.gmra.mxu1 %v202_v27 }
  0xfd   :  { %867 = vmatpush3.msra.mxu1 %v317_v32  ;;  %882 = vmatprep.mubr.msk.f32.mxu1 %vm968_vm4, %v966_v5 }
  0xfe   :  { %868 = vmatprep.subr.mxu1 %v966_v5 }
  0xff   :  { %869 = vmatpush3.msra.mxu1 %v316_v34 }
 0x100   :  { %870 = vmatprep.subr.mxu1 %v966_v5 }
 0x101   :  { %871 = vmatpush3.msra.mxu1 %v315_v36 }
 0x102   :  { %872 = vmatprep.subr.mxu1 %v966_v5 }
 0x103   :  { %873 = vmatpush3.msra.mxu1 %v314_v38 }
 0x104   :  { %874 = vmatprep.subr.mxu1 %v966_v5 }
 0x105   :  { %875 = vmatpush3.msra.mxu1 %v313_v40 }
 0x106   :  { %876 = vmatprep.subr.mxu1 %v966_v5 }
 0x107   :  { %877 = vmatpush3.msra.mxu1 %v312_v42 }
 0x108   :  { %878 = vmatprep.subr.mxu1 %v966_v5 }
 0x109   :  { %879 = vmatpush3.msra.mxu1 %v311_v44 }
 0x10a   :  { %880 = vmatprep.subr.mxu1 %v966_v5 }
 0x10b   :  { %881 = vmatpush3.msra.mxu1 %v310_v46 }
 0x10c   :  { %904 = vmatprep.subr.mxu1 %v966_v5 }
 0x1bc   :  { %v299_v29 = vpop.f32.mrf.mxu1 }
 0x1bd   :  { %v300_v30 = vadd.f32 %v822_v28, %v299_v29 }
 0x1be   :  { %v301_v31 = vpop.f32.mrf.mxu1 }
 0x1bf   :  { %v304_v16 = vsel %vm303_vm3, %v300_v30, -inf }
 0x1c0   :  { %305 = vmax.xlane.f32.xlu0 %v304_v16 }
 0x249   :  { %v306_v48 = vpop.xlane.xlu0 %305 }
 0x24a   :  { %v307_v49 = vsub.f32 %v300_v30, %v306_v48 }
 0x24c   :  { %v308_v50 = vmul.f32 1.442695, %v307_v49 }
 0x24e   :  { %940 = vpow2.f32 %v308_v50 }
 0x25b   :  { %v941_v51 = vpop.eup %940 }
 0x25c   :  { %883 = vmatmul.mubr.msk.f32.vlgmr.msra.gmra.mxu1 %vm318_vm5, %v941_v51  ;;  %902 = vmatmul.mubr.msk.f32.vlgmr.msra.gmra.mxu0 %vm318_vm5, %v941_v51 }
 0x25d   :  { %906 = vmatprep.mubr.msk.f32.mxu1 %vm968_vm4, %v966_v5  ;;  %933 = vmatprep.mubr.msk.f32.mxu0 %vm968_vm4, %v966_v5 }
 0x25e   :  { %905 = vmatpush3.msk.msra.mxu1 %vm124_vm1, %v473_v52  ;;  %926 = vmatpush3.msra.mxu0 %v722_v1 }
 0x25f   :  { %909 = vmatprep.subr.mxu1 %v966_v5  ;;  %927 = vmatprep.subr.mxu0 %v966_v5 }
 0x260   :  { %907 = vmatmul.mubr.msk.f32.vlgmr.msra.gmra.mxu1 %vm474_vm6, %v1109_v26  ;;  %928 = vmatpush3.msra.mxu0 %v721_v9 }
 0x261   :  { %910 = vmatpush3.msra.mxu1 %v472_v53  ;;  %911 = vmatprep.mubr.msk.f32.mxu1 %vm968_vm4, %v966_v5 }
 0x262   :  { %914 = vmatprep.subr.mxu1 %v966_v5  ;;  %929 = vmatprep.subr.mxu0 %v966_v5 }
 0x263   :  { %930 = vmatpush3.msra.mxu0 %v720_v10 }
 0x264   :  { %931 = vmatprep.subr.mxu0 %v966_v5 }
 0x265   :  { %932 = vmatpush3.msra.mxu0 %v719_v11 }
 0x31c   :  { %v388_v54 = vpop.f32.mrf.mxu1  ;;  %v466_v55 = vpop.f32.mrf.mxu0 }
 0x31d   :  { %942 = vrcp.f32 %v466_v55 }
 0x31e   :  { %v884_v56 = vpop.f32.mrf.mxu1  ;;  %v903_v57 = vpop.f32.mrf.mxu0 }
 0x320   :  { %v546_v26 = vpop.f32.mrf.mxu1 }
 0x322   :  { %v908_v60 = vpop.f32.mrf.mxu1 }
 0x32a   :  { %v943_v58 = vpop.eup %942 }
 0x32b   :  { %v471_v59 = vmul.f32 %v943_v58, %v388_v54 }
 0x32d   :  { %912 = vmatmul.mubr.msk.f32.vlgmr.msra.gmra.mxu1 %vm550_vm7, %v471_v59 }
 0x32e   :  { %922 = vmatprep.mubr.msk.f32.mxu1 %vm968_vm4, %v966_v5  ;;  %915 = vmatpush3.msra.mxu1 %v636_v61 }
 0x32f   :  { %916 = vmatprep.subr.mxu1 %v966_v5 }
 0x330   :  { %917 = vmatpush3.msra.mxu1 %v635_v62 }
 0x331   :  { %918 = vmatprep.subr.mxu1 %v966_v5 }
 0x332   :  { %919 = vmatpush3.msra.mxu1 %v634_v63 }
 0x333   :  { %920 = vmatprep.subr.mxu1 %v966_v5 }
 0x334   :  { %921 = vmatpush3.msra.mxu1 %v633_v0 }
 0x3ed   :  { %v620_v2 = vpop.f32.mrf.mxu1 }
 0x3ee   :  { %v621_v4 = vadd.f32 %v620_v2, %v546_v26 }
 0x3ef   :  { %v913_v6 = vpop.f32.mrf.mxu1 }
 0x3f0   :  { %v631_v7 = vadd.f32 %v829_v3, %v621_v4 }
 0x3f2   :  { %v632_v8 = vmax.f32 %v631_v7, 0.0 }
 0x3f4   :  { %923 = vmatmul.mubr.msk.f32.vlgmr.msra.gmra.mxu1 %vm644_vm8, %v632_v8 }
 0x4b4   :  { %v714_v13 = vpop.f32.mrf.mxu1 }
 0x4b5   :  { %v715_v14 = vadd.f32 %v830_v12, %v714_v13 }
 0x4b6   :  { %v924_v15 = vpop.f32.mrf.mxu1 }
 0x4b7   :  { %v718_v17 = vmax.f32 %v715_v14, 0.0 }
 0x4b9   :  { %934 = vmatmul.mubr.msk.f32.vlgmr.msra.gmra.mxu0 %vm644_vm8, %v718_v17 }
 0x579   :  { %v799_v5 = vpop.f32.mrf.mxu0 }
 0x57a   :  { %v800_v19 = vadd.f32 %v832_v18, %v799_v5 }
 0x57b   :  { %v935_v20 = vpop.f32.mrf.mxu0 }
 0x57c   :  { %804 = vst.msk [vmem:[#allocation2] sm:$0x3] %vm803_vm9, %v800_v19 }
 0x57d   :  { %955 = shalt.err (!%p952_p4)
}
 0x57e   :  { %814 = dma.vmem_to_hbm [thread:$0]  %s812_s5, 32, %s1437_s14, [#allocation3]  }
 0x57f   :  { %964 = dma.done.wait [#allocation3], 32  }
 0x580   :  { %965 = vsyncadd [#allocation3], 4294967264 }
 0x581   :  { %818 = vsyncpa [#allocation3], 1 }

</bundles_post_ra>
